<compile_context>
chip_gen: v5e
topology: v5e:2x2
jax: 0.10.0
libtpu: 0.0.40
codegen_flags: <defaults>
</compile_context>

<pallas_src>
import jax
import jax.numpy as jnp
from jax.experimental import pallas as pl
from jax.experimental.pallas import tpu as pltpu

LANE = 128
SUBLANE = 8


def _round_up(n: int, m: int) -> int:
    return ((n + m - 1) // m) * m


def _make_mlp_kernel(n_linear: int):
    """MLP with `n_linear` Linear layers and tanh between them (dropout p=0)."""

    def kernel(*refs):
        x_ref = refs[0]
        o_ref = refs[-1]
        p = refs[1:-1]  # (w0, b0, w1, b1, ...), feature dims already padded

        h = x_ref[...]
        for i in range(n_linear):
            w = p[2 * i][...]
            b = p[2 * i + 1][...].astype(jnp.float32)  # (1, out_pad)
            # bf16 operands go straight to the MXU when param_dtype=bf16;
            # accumulation is always f32.  Bias add / tanh stay f32.
            h = jnp.dot(h.astype(w.dtype), w,
                        preferred_element_type=jnp.float32) + b
            if i < n_linear - 1:
                # nn.Dropout(p=0.0) between hidden linears is the identity.
                h = jnp.tanh(h)
        o_ref[...] = h.astype(o_ref.dtype)

    return kernel


def _pick_batch_tile(batch: int, widest_feat: int) -> int:
    """Generation-aware default batch tile.

    v5e/v6e (single TensorCore): one big tile (grid=1) -- an extra grid step
    only adds ~0.35us pipeline overhead on a few-microsecond kernel.
    v7x (two TensorCores): split the batch into two steps so
    dimension_semantics=("parallel",) can shard across both cores.
    Tiles are capped so one f32 activation slab stays within ~4 MiB of VMEM.
    """
    batch8 = _round_up(batch, SUBLANE)
    try:
        kind = jax.devices()[0].device_kind.lower()
    except Exception:
        kind = ""
    dual_tc = "v7" in kind
    if dual_tc and batch8 >= 2 * SUBLANE:
        tile = _round_up(-(-batch8 // 2), SUBLANE)
    else:
        tile = batch8
    max_rows = (4 * 1024 * 1024) // (4 * max(widest_feat, LANE))
    max_rows = max(SUBLANE, (max_rows // SUBLANE) * SUBLANE)
    return min(tile, max_rows)


def nn_transform_forward(x, params, *, batch_tile=None,
                         param_dtype=jnp.bfloat16, dropout=0.0):
    """NNTransform MLP forward pass as a single Pallas TPU kernel.

    x:           [batch, input_features]
    params:      list of (W, b) with W: [in, out], b: [out]
    batch_tile:  rows per grid step (multiple of 8); default is
                 generation-aware (grid=1 on v5e/v6e, 2 steps on v7x).
    param_dtype: dtype weights/biases are fed to the kernel in (default bf16;
                 matmuls always accumulate f32, bias add / tanh are f32).
    dropout:     must be 0.0 -- the kernel implements eval-mode / p=0 dropout
                 (identity), matching the module default.
    """
    # TODO(synk): training-mode dropout with p > 0 is not implemented.
    assert dropout == 0.0, "kernel implements Dropout(p=0.0) only (identity)"

    orig_dtype = x.dtype
    batch, in_feat = x.shape
    n_linear = len(params)
    out_feat = params[-1][0].shape[1]

    # --- advisory cost estimate on the true (unpadded) problem -------------
    p_itemsize = jnp.dtype(param_dtype).itemsize
    flops = sum(2 * batch * w.shape[0] * w.shape[1] for (w, _) in params)
    transcendentals = batch * sum(w.shape[1] for (w, _) in params[:-1])
    bytes_accessed = (
        batch * in_feat * x.dtype.itemsize
        + sum(int(w.size) + int(b.size) for (w, b) in params) * p_itemsize
        + batch * out_feat * jnp.dtype(orig_dtype).itemsize
    )

    # --- tiling -------------------------------------------------------------
    in_feat_pad = _round_up(in_feat, SUBLANE)  # first matmul's K (sublanes)
    hidden_pads = [_round_up(w.shape[1], LANE) for (w, _) in params[:-1]]
    widest = max([in_feat_pad, out_feat] + hidden_pads)
    if batch_tile is None:
        batch_tile = _pick_batch_tile(batch, widest)
    batch_tile = max(SUBLANE, _round_up(batch_tile, SUBLANE))
    batch_pad = _round_up(batch, batch_tile)

    # Pad x: extra batch rows are zeros (sliced off later); the input-feature
    # dim only needs a sublane multiple for the first MXU matmul.
    if (batch_pad, in_feat_pad) != (batch, in_feat):
        x = jnp.pad(x, ((0, batch_pad - batch), (0, in_feat_pad - in_feat)))

    # Zero-pad hidden feature dims to lane multiples (128) so the hidden-layer
    # matmuls see full lanes.  The final output dim is NOT padded: its block
    # last dim equals the full array dim (exempt from the (8,128) rule), so we
    # never write a padded slab.  Padding is numerically inert: tanh(0)=0 and
    # padded weight rows/cols and padded biases are 0.
    flat_params = []
    for li, (w, b) in enumerate(params):
        di, do = w.shape
        di_p = in_feat_pad if li == 0 else _round_up(di, LANE)
        do_p = do if li == n_linear - 1 else _round_up(do, LANE)
        w_p = jnp.pad(w, ((0, di_p - di), (0, do_p - do))).astype(param_dtype)
        b_p = jnp.pad(b.reshape(1, -1), ((0, 0), (0, do_p - do))).astype(param_dtype)
        flat_params += [w_p, b_p]

    grid = (batch_pad // batch_tile,)

    x_spec = pl.BlockSpec((batch_tile, in_feat_pad), lambda i: (i, 0))
    out_spec = pl.BlockSpec((batch_tile, out_feat), lambda i: (i, 0))

    # Parameters are grid-invariant; give each its full extent every step.
    # Single-buffer them when large so the default double-buffer does not blow
    # v7x's 64 MiB VMEM at big hidden_units (irrelevant at hidden=20).
    param_bytes = sum(int(p.size) * p.dtype.itemsize for p in flat_params)
    if param_bytes > (8 << 20):
        param_specs = [pl.BlockSpec(p.shape, lambda i: (0, 0),
                                    pipeline_mode=pl.Buffered(1))
                       for p in flat_params]
    else:
        param_specs = [pl.BlockSpec(p.shape, lambda i: (0, 0))
                       for p in flat_params]

    kernel = _make_mlp_kernel(n_linear)

    y = pl.pallas_call(
        kernel,
        grid=grid,
        in_specs=[x_spec] + param_specs,
        out_specs=out_spec,
        out_shape=jax.ShapeDtypeStruct((batch_pad, out_feat), orig_dtype),
        compiler_params=pltpu.CompilerParams(
            dimension_semantics=("parallel",),
        ),
        cost_estimate=pl.CostEstimate(
            flops=flops,
            transcendentals=transcendentals,
            bytes_accessed=bytes_accessed,
        ),
    )(x, *flat_params)

    return y if batch_pad == batch else y[:batch]


def init_params(key, input_features, output_features, hidden_layers, hidden_units):
    """Deterministic parameter init matching the NNTransform layer shapes."""
    dims = (
        [(input_features, hidden_units)]
        + [(hidden_units, hidden_units)] * hidden_layers
        + [(hidden_units, output_features)]
    )
    params = []
    for (fan_in, fan_out) in dims:
        key, kw, kb = jax.random.split(key, 3)
        bound = 1.0 / jnp.sqrt(fan_in)  # PyTorch nn.Linear default init
        w = jax.random.uniform(kw, (fan_in, fan_out), jnp.float32, -bound, bound)
        b = jax.random.uniform(kb, (fan_out,), jnp.float32, -bound, bound)
        params.append((w, b))
    return params


def reference_forward(x, params, param_dtype=None):
    """Pure-JAX reference.  With param_dtype set, mimics the kernel's mixed
    precision (operands quantized, f32 accumulation, f32 bias add / tanh)."""
    h = x
    n = len(params)
    for i, (w, b) in enumerate(params):
        if param_dtype is not None:
            w = w.astype(param_dtype)
            b = b.astype(param_dtype).astype(jnp.float32)
            h = h.astype(param_dtype)
        h = jnp.dot(h, w, preferred_element_type=jnp.float32) + b
        if i < n - 1:
            h = jnp.tanh(h)
    return h


if __name__ == "__main__":
    # NNTransform defaults: input_features=2, output_features=2,
    # hidden_layers=2, hidden_units=20, dropout=0.0, activation='tanh'
    input_features = 2
    output_features = 2
    hidden_layers = 2
    hidden_units = 20
    batch = 64  # small deterministic example

    key = jax.random.PRNGKey(0)
    key, kx = jax.random.split(key)
    x = jax.random.normal(kx, (batch, input_features), jnp.float32)

    params = init_params(
        key, input_features, output_features, hidden_layers, hidden_units
    )

    # f32 parameter path: directly comparable with the pure-f32 reference.
    y32 = nn_transform_forward(x, params, param_dtype=jnp.float32)
    y32 = jax.block_until_ready(y32)
    y_ref = reference_forward(x, params)
    assert y32.shape == (batch, output_features)
    assert jnp.allclose(y32, y_ref, atol=1e-4, rtol=1e-4), "f32 path mismatch"

    # default bf16-parameter path: compare against a matched mixed-precision
    # reference, plus a coarse check against the pure-f32 reference.
    y16 = nn_transform_forward(x, params)  # param_dtype defaults to bf16
    y16 = jax.block_until_ready(y16)
    y_ref16 = reference_forward(x, params, param_dtype=jnp.bfloat16)
    assert y16.shape == (batch, output_features)
    assert jnp.allclose(y16, y_ref16, atol=5e-3, rtol=5e-3), "bf16 path mismatch"
    assert jnp.allclose(y16, y_ref, atol=5e-2, rtol=5e-2), "bf16 vs f32 drift"

    print("KERNEL_OK")
</pallas_src>

<mosaic_0001>
module attributes {stable_mosaic.version = 11 : i64} {
  func.func @kernel(%arg0: i32, %arg1: memref<64x8xf32, #tpu.memory_space<vmem>>, %arg2: memref<8x128xf32, #tpu.memory_space<vmem>>, %arg3: memref<1x128xf32, #tpu.memory_space<vmem>>, %arg4: memref<128x128xf32, #tpu.memory_space<vmem>>, %arg5: memref<1x128xf32, #tpu.memory_space<vmem>>, %arg6: memref<128x128xf32, #tpu.memory_space<vmem>>, %arg7: memref<1x128xf32, #tpu.memory_space<vmem>>, %arg8: memref<128x2xf32, #tpu.memory_space<vmem>>, %arg9: memref<1x2xf32, #tpu.memory_space<vmem>>, %arg10: memref<64x2xf32, #tpu.memory_space<vmem>>) attributes {dimension_semantics = [#tpu.dimension_semantics<parallel>], iteration_bounds = array<i64: 1>, scalar_prefetch = 0 : i64, scratch_operands = 0 : i64, tpu.core_type = #tpu.core_type<tc>, window_params = [{transform_indices = @transform_0, window_bounds = array<i64: 64, 8>}, {pipeline_mode = #tpu.pipeline_mode<synchronous>, transform_indices = @transform_1, window_bounds = array<i64: 8, 128>}, {pipeline_mode = #tpu.pipeline_mode<synchronous>, transform_indices = @transform_2, window_bounds = array<i64: 1, 128>}, {pipeline_mode = #tpu.pipeline_mode<synchronous>, transform_indices = @transform_3, window_bounds = array<i64: 128, 128>}, {pipeline_mode = #tpu.pipeline_mode<synchronous>, transform_indices = @transform_4, window_bounds = array<i64: 1, 128>}, {pipeline_mode = #tpu.pipeline_mode<synchronous>, transform_indices = @transform_5, window_bounds = array<i64: 128, 128>}, {pipeline_mode = #tpu.pipeline_mode<synchronous>, transform_indices = @transform_6, window_bounds = array<i64: 1, 128>}, {pipeline_mode = #tpu.pipeline_mode<synchronous>, transform_indices = @transform_7, window_bounds = array<i64: 128, 2>}, {pipeline_mode = #tpu.pipeline_mode<synchronous>, transform_indices = @transform_8, window_bounds = array<i64: 1, 2>}, {transform_indices = @transform_9, window_bounds = array<i64: 64, 2>}]} {
    %c0 = arith.constant 0 : index
    %c0_0 = arith.constant 0 : index
    %0 = vector.load %arg1[%c0, %c0_0] : memref<64x8xf32, #tpu.memory_space<vmem>>, vector<64x8xf32>
    %c0_1 = arith.constant 0 : index
    %c0_2 = arith.constant 0 : index
    %1 = vector.load %arg2[%c0_1, %c0_2] : memref<8x128xf32, #tpu.memory_space<vmem>>, vector<8x128xf32>
    %c0_3 = arith.constant 0 : index
    %c0_4 = arith.constant 0 : index
    %2 = vector.load %arg3[%c0_3, %c0_4] : memref<1x128xf32, #tpu.memory_space<vmem>>, vector<1x128xf32>
    %cst = arith.constant dense<0.000000e+00> : vector<64x128xf32>
    %3 = tpu.matmul %0, %1, %cst {dimension_numbers = #tpu.dot_dimension_numbers<[1], [0], [0], [1], [0, 0, 1, 1], [], []>} : vector<64x8xf32>, vector<8x128xf32>, vector<64x128xf32> -> vector<64x128xf32>
    %4 = vector.broadcast %2 : vector<1x128xf32> to vector<64x128xf32>
    %5 = arith.addf %3, %4 : vector<64x128xf32>
    %6 = math.tanh %5 : vector<64x128xf32>
    %c0_5 = arith.constant 0 : index
    %c0_6 = arith.constant 0 : index
    %7 = vector.load %arg4[%c0_5, %c0_6] : memref<128x128xf32, #tpu.memory_space<vmem>>, vector<128x128xf32>
    %c0_7 = arith.constant 0 : index
    %c0_8 = arith.constant 0 : index
    %8 = vector.load %arg5[%c0_7, %c0_8] : memref<1x128xf32, #tpu.memory_space<vmem>>, vector<1x128xf32>
    %cst_9 = arith.constant dense<0.000000e+00> : vector<64x128xf32>
    %9 = tpu.matmul %6, %7, %cst_9 {dimension_numbers = #tpu.dot_dimension_numbers<[1], [0], [0], [1], [0, 0, 1, 1], [], []>} : vector<64x128xf32>, vector<128x128xf32>, vector<64x128xf32> -> vector<64x128xf32>
    %10 = vector.broadcast %8 : vector<1x128xf32> to vector<64x128xf32>
    %11 = arith.addf %9, %10 : vector<64x128xf32>
    %12 = math.tanh %11 : vector<64x128xf32>
    %c0_10 = arith.constant 0 : index
    %c0_11 = arith.constant 0 : index
    %13 = vector.load %arg6[%c0_10, %c0_11] : memref<128x128xf32, #tpu.memory_space<vmem>>, vector<128x128xf32>
    %c0_12 = arith.constant 0 : index
    %c0_13 = arith.constant 0 : index
    %14 = vector.load %arg7[%c0_12, %c0_13] : memref<1x128xf32, #tpu.memory_space<vmem>>, vector<1x128xf32>
    %cst_14 = arith.constant dense<0.000000e+00> : vector<64x128xf32>
    %15 = tpu.matmul %12, %13, %cst_14 {dimension_numbers = #tpu.dot_dimension_numbers<[1], [0], [0], [1], [0, 0, 1, 1], [], []>} : vector<64x128xf32>, vector<128x128xf32>, vector<64x128xf32> -> vector<64x128xf32>
    %16 = vector.broadcast %14 : vector<1x128xf32> to vector<64x128xf32>
    %17 = arith.addf %15, %16 : vector<64x128xf32>
    %18 = math.tanh %17 : vector<64x128xf32>
    %c0_15 = arith.constant 0 : index
    %c0_16 = arith.constant 0 : index
    %19 = vector.load %arg8[%c0_15, %c0_16] : memref<128x2xf32, #tpu.memory_space<vmem>>, vector<128x2xf32>
    %c0_17 = arith.constant 0 : index
    %c0_18 = arith.constant 0 : index
    %20 = vector.load %arg9[%c0_17, %c0_18] : memref<1x2xf32, #tpu.memory_space<vmem>>, vector<1x2xf32>
    %cst_19 = arith.constant dense<0.000000e+00> : vector<64x2xf32>
    %21 = tpu.matmul %18, %19, %cst_19 {dimension_numbers = #tpu.dot_dimension_numbers<[1], [0], [0], [1], [0, 0, 1, 1], [], []>} : vector<64x128xf32>, vector<128x2xf32>, vector<64x2xf32> -> vector<64x2xf32>
    %22 = vector.broadcast %20 : vector<1x2xf32> to vector<64x2xf32>
    %23 = arith.addf %21, %22 : vector<64x2xf32>
    %c0_20 = arith.constant 0 : index
    %c0_21 = arith.constant 0 : index
    %24 = vector.load %arg10[%c0_20, %c0_21] : memref<64x2xf32, #tpu.memory_space<vmem>>, vector<64x2xf32>
    tpu.vector_store %arg10[%c0_20, %c0_21], %23 {strides = array<i32>} : memref<64x2xf32, #tpu.memory_space<vmem>>, vector<64x2xf32>,
    return
  }
  func.func @transform_0(%arg0: i32) -> (i32, i32) {
    %c0_i32 = arith.constant 0 : i32
    %c0_i32_0 = arith.constant 0 : i32
    return %arg0, %c0_i32 : i32, i32
  }
  func.func @transform_1(%arg0: i32) -> (i32, i32) {
    %c0_i32 = arith.constant 0 : i32
    %c0_i32_0 = arith.constant 0 : i32
    %c0_i32_1 = arith.constant 0 : i32
    return %c0_i32, %c0_i32_0 : i32, i32
  }
  func.func @transform_2(%arg0: i32) -> (i32, i32) {
    %c0_i32 = arith.constant 0 : i32
    %c0_i32_0 = arith.constant 0 : i32
    %c0_i32_1 = arith.constant 0 : i32
    return %c0_i32, %c0_i32_0 : i32, i32
  }
  func.func @transform_3(%arg0: i32) -> (i32, i32) {
    %c0_i32 = arith.constant 0 : i32
    %c0_i32_0 = arith.constant 0 : i32
    %c0_i32_1 = arith.constant 0 : i32
    return %c0_i32, %c0_i32_0 : i32, i32
  }
  func.func @transform_4(%arg0: i32) -> (i32, i32) {
    %c0_i32 = arith.constant 0 : i32
    %c0_i32_0 = arith.constant 0 : i32
    %c0_i32_1 = arith.constant 0 : i32
    return %c0_i32, %c0_i32_0 : i32, i32
  }
  func.func @transform_5(%arg0: i32) -> (i32, i32) {
    %c0_i32 = arith.constant 0 : i32
    %c0_i32_0 = arith.constant 0 : i32
    %c0_i32_1 = arith.constant 0 : i32
    return %c0_i32, %c0_i32_0 : i32, i32
  }
  func.func @transform_6(%arg0: i32) -> (i32, i32) {
    %c0_i32 = arith.constant 0 : i32
    %c0_i32_0 = arith.constant 0 : i32
    %c0_i32_1 = arith.constant 0 : i32
    return %c0_i32, %c0_i32_0 : i32, i32
  }
  func.func @transform_7(%arg0: i32) -> (i32, i32) {
    %c0_i32 = arith.constant 0 : i32
    %c0_i32_0 = arith.constant 0 : i32
    %c0_i32_1 = arith.constant 0 : i32
    return %c0_i32, %c0_i32_0 : i32, i32
  }
  func.func @transform_8(%arg0: i32) -> (i32, i32) {
    %c0_i32 = arith.constant 0 : i32
    %c0_i32_0 = arith.constant 0 : i32
    %c0_i32_1 = arith.constant 0 : i32
    return %c0_i32, %c0_i32_0 : i32, i32
  }
  func.func @transform_9(%arg0: i32) -> (i32, i32) {
    %c0_i32 = arith.constant 0 : i32
    %c0_i32_0 = arith.constant 0 : i32
    return %arg0, %c0_i32 : i32, i32
  }
}

</mosaic_0001>

<bundles_post_ra>
// kernel: tpu_custom_call.1
= control target key start
LH: loop header
LB: loop body
LE: loop exit
PB: predicated region body
PF: predicated region fallthrough
CT: control target
= control target key end

     0   :  { %14 = vsyncpa [#allocation3], 0  ;;  %s453_s12 = smov [#allocation2]   ;;  %s454_s14 = smov 128   ;;  %s684_s0 = inlined_call_operand.vmem [shape: f32[64,8], index: 0, kind: input, shape index: {}]   ;;  %s685_s1 = inlined_call_operand.vmem [shape: f32[8,128], index: 1, kind: input, shape index: {}]   ;;  %s686_s2 = inlined_call_operand.vmem [shape: f32[1,128], index: 2, kind: input, shape index: {}]   ;;  %s687_s3 = inlined_call_operand.vmem [shape: f32[128,128], index: 3, kind: input, shape index: {}]   ;;  %s688_s4 = inlined_call_operand.vmem [shape: f32[1,128], index: 4, kind: input, shape index: {}]   ;;  %s689_s5 = inlined_call_operand.hbm [shape: f32[128,128], index: 5, kind: input, shape index: {}]   ;;  %s690_s6 = inlined_call_operand.vmem [shape: f32[1,128], index: 6, kind: input, shape index: {}]   ;;  %s691_s7 = inlined_call_operand.vmem [shape: f32[128,2], index: 7, kind: input, shape index: {}]   ;;  %s692_s8 = inlined_call_operand.vmem [shape: f32[1,2], index: 8, kind: input, shape index: {}]   ;;  %s693_s9 = inlined_call_operand.vmem [shape: f32[64,2], index: 9, kind: output, shape index: {}]  }
   0x1   :  { %s29_s11 = sshll.u32 %s689_s5, 4  ;;  %s31_s13 = sshll.u32 %s453_s12, 4  ;;  %s30_s11 = int_to_ptr.hbm [resolvable:$true] %s29_s11  ;;  %s32_s13 = int_to_ptr.vmem [resolvable:$true] %s31_s13 }
   0x2   :  { %s455_s15 = smov 8  }
   0x3   :  { %37 = dma.hbm_to_vmem [thread:$0]  %s30_s11, 2048, %s32_s13, [#allocation3], %s454_s14, %s454_s14, %s455_s15  }
   0x4   :  { %451 = dma.done.wait [#allocation3], 2048  }
   0x5   :  { %452 = vsyncadd [#allocation3], 4294965248  ;;  %vm61_vm0 = vcmask 64512   ;;  %v56_v0 = vld [vmem:[%s685_s1] sm:$0xff]  ;;  %v49_v2 = vld [vmem:[%s684_s0 + $0x8] sm:$0xff]  ;;  %vm334_vm1 = vcmask 15360  }
   0x6   :  { %v48_v1 = vld [vmem:[%s684_s0] sm:$0xff]  ;;  %101 = vmatpush.msra.mxu0 %v56_v0  ;;  %v50_v3 = vld [vmem:[%s684_s0 + $0x10] sm:$0xff]  ;;  %v51_v4 = vld [vmem:[%s684_s0 + $0x18] sm:$0xff] }
   0x7   :  { %348 = vmatmul.msk.f32.vlgmr.msra.gmra.mxu0 %vm61_vm0, %v48_v1  ;;  %v150_v5 = vld [vmem:[%s687_s3 + $0x78] sm:$0xff]  ;;  %v149_v6 = vld [vmem:[%s687_s3 + $0x70] sm:$0xff]  ;;  %v148_v7 = vld [vmem:[%s687_s3 + $0x68] sm:$0xff] }
   0x8   :  { %155 = vmatpush.msrb.mxu0 %v150_v5  ;;  %356 = vmatpush.msra.mxu1 %v150_v5  ;;  %v147_v8 = vld [vmem:[%s687_s3 + $0x60] sm:$0xff]  ;;  %v146_v10 = vld [vmem:[%s687_s3 + $0x58] sm:$0xff]  ;;  %v145_v11 = vld [vmem:[%s687_s3 + $0x50] sm:$0xff] }
   0x9   :  { %v52_v9 = vld [vmem:[%s684_s0 + $0x20] sm:$0xff]  ;;  %v144_v12 = vld [vmem:[%s687_s3 + $0x48] sm:$0xff]  ;;  %v142_v15 = vld [vmem:[%s687_s3 + $0x38] sm:$0xff] }
   0xa   :  { %156 = vmatpush.msrb.mxu0 %v149_v6  ;;  %357 = vmatpush.msra.mxu1 %v149_v6  ;;  %v143_v13 = vld [vmem:[%s687_s3 + $0x40] sm:$0xff]  ;;  %v53_v14 = vld [vmem:[%s684_s0 + $0x28] sm:$0xff]  ;;  %v141_v16 = vld [vmem:[%s687_s3 + $0x30] sm:$0xff] }
   0xb   :  { %v140_v17 = vld [vmem:[%s687_s3 + $0x28] sm:$0xff]  ;;  %v139_v18 = vld [vmem:[%s687_s3 + $0x20] sm:$0xff]  ;;  %v54_v19 = vld [vmem:[%s684_s0 + $0x30] sm:$0xff] }
   0xc   :  { %157 = vmatpush.msrb.mxu0 %v148_v7  ;;  %358 = vmatpush.msra.mxu1 %v148_v7  ;;  %v138_v20 = vld [vmem:[%s687_s3 + $0x18] sm:$0xff]  ;;  %v137_v21 = vld [vmem:[%s687_s3 + $0x10] sm:$0xff]  ;;  %v136_v23 = vld [vmem:[%s687_s3 + $0x8] sm:$0xff] }
   0xd   :  { %v55_v22 = vld [vmem:[%s684_s0 + $0x38] sm:$0xff]  ;;  %v135_v24 = vld [vmem:[%s687_s3] sm:$0xff]  ;;  %v218_v41 = vld [vmem:[#allocation2 + $0x70] sm:$0xff] }
   0xe   :  { %158 = vmatpush.msrb.mxu0 %v147_v8  ;;  %359 = vmatpush.msra.mxu1 %v147_v8  ;;  %v375_v25 = vld [vmem:[%s686_s2] ss:$0 sm:$0xff]  ;;  %v219_v40 = vld [vmem:[#allocation2 + $0x78] sm:$0xff]  ;;  %v217_v42 = vld [vmem:[#allocation2 + $0x68] sm:$0xff] }
   0xf   :  { %349 = vmatmul.msk.f32.gmra.mxu0 %vm61_vm0, %v49_v2  ;;  %224 = vmatpush.msra.mxu2 %v219_v40  ;;  %v216_v43 = vld [vmem:[#allocation2 + $0x60] sm:$0xff]  ;;  %v215_v45 = vld [vmem:[#allocation2 + $0x58] sm:$0xff]  ;;  %v214_v48 = vld [vmem:[#allocation2 + $0x50] sm:$0xff] }
  0x10   :  { %159 = vmatpush.msrb.mxu0 %v146_v10  ;;  %360 = vmatpush.msra.mxu1 %v146_v10  ;;  %v213_v49 = vld [vmem:[#allocation2 + $0x48] sm:$0xff]  ;;  %v212_v50 = vld [vmem:[#allocation2 + $0x40] sm:$0xff]  ;;  %v211_v52 = vld [vmem:[#allocation2 + $0x38] sm:$0xff] }
  0x11   :  { %225 = vmatpush.msra.mxu2 %v218_v41  ;;  %v210_v55 = vld [vmem:[#allocation2 + $0x30] sm:$0xff]  ;;  %v209_v56 = vld [vmem:[#allocation2 + $0x28] sm:$0xff]  ;;  %v208_v61 = vld [vmem:[#allocation2 + $0x20] sm:$0xff] }
  0x12   :  { %160 = vmatpush.msrb.mxu0 %v145_v11  ;;  %361 = vmatpush.msra.mxu1 %v145_v11  ;;  %v207_v62 = vld [vmem:[#allocation2 + $0x18] sm:$0xff]  ;;  %v206_v63 = vld [vmem:[#allocation2 + $0x10] sm:$0xff]  ;;  %v205_v0 = vld [vmem:[#allocation2 + $0x8] sm:$0xff] }
  0x13   :  { %226 = vmatpush.msra.mxu2 %v217_v42  ;;  %v204_v1 = vld [vmem:[#allocation2] sm:$0xff]  ;;  %v275_v40 = vld [vmem:[%s691_s7 + $0x10] sm:$0xff]  ;;  %v274_v41 = vld [vmem:[%s691_s7 + $0x8] sm:$0xff] }
  0x14   :  { %161 = vmatpush.msrb.mxu0 %v144_v12  ;;  %362 = vmatpush.msra.mxu1 %v144_v12  ;;  %v376_v2 = vld [vmem:[%s688_s4] ss:$0 sm:$0xff] }
  0x15   :  { %227 = vmatpush.msra.mxu2 %v216_v43  ;;  %v273_v42 = vld [vmem:[%s691_s7] sm:$0xff] }
  0x16   :  { %162 = vmatpush.msrb.mxu0 %v143_v13  ;;  %363 = vmatpush.msra.mxu1 %v143_v13  ;;  %v377_v43 = vld [vmem:[%s690_s6] ss:$0 sm:$0xff] }
  0x17   :  { %350 = vmatmul.msk.f32.gmra.mxu0 %vm61_vm0, %v50_v3  ;;  %228 = vmatpush.msra.mxu2 %v215_v45 }
  0x18   :  { %163 = vmatpush.msrb.mxu0 %v142_v15  ;;  %364 = vmatpush.msra.mxu1 %v142_v15 }
  0x19   :  { %229 = vmatpush.msra.mxu2 %v214_v48 }
  0x1a   :  { %164 = vmatpush.msrb.mxu0 %v141_v16  ;;  %365 = vmatpush.msra.mxu1 %v141_v16 }
  0x1b   :  { %230 = vmatpush.msra.mxu2 %v213_v49 }
  0x1c   :  { %165 = vmatpush.msrb.mxu0 %v140_v17  ;;  %366 = vmatpush.msra.mxu1 %v140_v17  ;;  %v288_v17 = vld [vmem:[%s691_s7 + $0x78] sm:$0xff] }
  0x1d   :  { %231 = vmatpush.msra.mxu2 %v212_v50  ;;  %293 = vmatpush.msra.mxu3 %v288_v17 }
  0x1e   :  { %166 = vmatpush.msrb.mxu0 %v139_v18  ;;  %367 = vmatpush.msra.mxu1 %v139_v18  ;;  %v287_v18 = vld [vmem:[%s691_s7 + $0x70] sm:$0xff] }
  0x1f   :  { %351 = vmatmul.msk.f32.gmra.mxu0 %vm61_vm0, %v51_v4  ;;  %232 = vmatpush.msra.mxu2 %v211_v52 }
  0x20   :  { %167 = vmatpush.msrb.mxu0 %v138_v20  ;;  %368 = vmatpush.msra.mxu1 %v138_v20  ;;  %v285_v20 = vld [vmem:[%s691_s7 + $0x60] sm:$0xff] }
  0x21   :  { %233 = vmatpush.msra.mxu2 %v210_v55  ;;  %294 = vmatpush.msra.mxu3 %v287_v18 }
  0x22   :  { %168 = vmatpush.msrb.mxu0 %v137_v21  ;;  %369 = vmatpush.msra.mxu1 %v137_v21 }
  0x23   :  { %234 = vmatpush.msra.mxu2 %v209_v56 }
  0x24   :  { %169 = vmatpush.msrb.mxu0 %v136_v23  ;;  %370 = vmatpush.msra.mxu1 %v136_v23 }
  0x25   :  { %235 = vmatpush.msra.mxu2 %v208_v61 }
  0x26   :  { %170 = vmatpush.msrb.mxu0 %v135_v24  ;;  %371 = vmatpush.msra.mxu1 %v135_v24 }
  0x27   :  { %352 = vmatmul.msk.f32.gmra.mxu0 %vm61_vm0, %v52_v9  ;;  %236 = vmatpush.msra.mxu2 %v207_v62 }
  0x29   :  { %237 = vmatpush.msra.mxu2 %v206_v63 }
  0x2b   :  { %238 = vmatpush.msra.mxu2 %v205_v0 }
  0x2d   :  { %239 = vmatpush.msra.mxu2 %v204_v1 }
  0x2f   :  { %353 = vmatmul.msk.f32.gmra.mxu0 %vm61_vm0, %v53_v14 }
  0x37   :  { %354 = vmatmul.msk.f32.gmra.mxu0 %vm61_vm0, %v54_v19  ;;  %v286_v19 = vld [vmem:[%s691_s7 + $0x68] sm:$0xff] }
  0x38   :  { %295 = vmatpush.msra.mxu3 %v286_v19 }
  0x3a   :  { %296 = vmatpush.msra.mxu3 %v285_v20 }
  0x3f   :  { %355 = vmatmul.msk.f32.gmra.mxu0 %vm61_vm0, %v55_v22  ;;  %v284_v22 = vld [vmem:[%s691_s7 + $0x58] sm:$0xff] }
  0x40   :  { %297 = vmatpush.msra.mxu3 %v284_v22 }
  0x84   :  { %v103_v26 = vpop.f32.mrf.mxu0 }
  0x85   :  { %v104_v27 = vadd.f32 %v375_v25, %v103_v26  ;;  %v282_v26 = vld [vmem:[%s691_s7 + $0x48] sm:$0xff] }
  0x87   :  { %379 = vtanh.f32 %v104_v27  ;;  %v281_v27 = vld [vmem:[%s691_s7 + $0x40] sm:$0xff] }
  0x8c   :  { %v106_v28 = vpop.f32.mrf.mxu0 }
  0x8d   :  { %v380_v29 = vpop.eup %379  ;;  %v107_v30 = vadd.f32 %v375_v25, %v106_v28 }
  0x8e   :  { %171 = vmatmul.f32.vlgmr.msrb.gmra.mxu0 %v380_v29  ;;  %v280_v29 = vld [vmem:[%s691_s7 + $0x38] sm:$0xff] }
  0x8f   :  { %381 = vtanh.f32 %v107_v30 }
  0x94   :  { %v109_v31 = vpop.f32.mrf.mxu0 }
  0x95   :  { %v382_v32 = vpop.eup %381  ;;  %v110_v33 = vadd.f32 %v375_v25, %v109_v31 }
  0x96   :  { %174 = vmatmul.f32.vlgmr.msra.gmra.mxu1 %v382_v32  ;;  %v279_v32 = vld [vmem:[%s691_s7 + $0x30] sm:$0xff] }
  0x97   :  { %383 = vtanh.f32 %v110_v33  ;;  %v278_v33 = vld [vmem:[%s691_s7 + $0x28] sm:$0xff] }
  0x9c   :  { %v112_v34 = vpop.f32.mrf.mxu0 }
  0x9d   :  { %v384_v35 = vpop.eup %383  ;;  %v113_v36 = vadd.f32 %v375_v25, %v112_v34 }
  0x9e   :  { %177 = vmatmul.f32.gmra.mxu1 %v384_v35 }
  0x9f   :  { %385 = vtanh.f32 %v113_v36 }
  0xa4   :  { %v115_v37 = vpop.f32.mrf.mxu0 }
  0xa5   :  { %v386_v38 = vpop.eup %385  ;;  %v116_v39 = vadd.f32 %v375_v25, %v115_v37 }
  0xa6   :  { %180 = vmatmul.f32.gmra.mxu1 %v386_v38  ;;  %v277_v38 = vld [vmem:[%s691_s7 + $0x20] sm:$0xff] }
  0xa7   :  { %387 = vtanh.f32 %v116_v39  ;;  %v276_v39 = vld [vmem:[%s691_s7 + $0x18] sm:$0xff] }
  0xac   :  { %v118_v44 = vpop.f32.mrf.mxu0 }
  0xad   :  { %v388_v46 = vpop.eup %387  ;;  %v119_v47 = vadd.f32 %v375_v25, %v118_v44 }
  0xae   :  { %183 = vmatmul.f32.gmra.mxu1 %v388_v46 }
  0xaf   :  { %389 = vtanh.f32 %v119_v47 }
  0xb4   :  { %v121_v51 = vpop.f32.mrf.mxu0 }
  0xb5   :  { %v390_v53 = vpop.eup %389  ;;  %v122_v54 = vadd.f32 %v375_v25, %v121_v51 }
  0xb6   :  { %186 = vmatmul.f32.gmra.mxu1 %v390_v53 }
  0xb7   :  { %391 = vtanh.f32 %v122_v54 }
  0xbc   :  { %v124_v57 = vpop.f32.mrf.mxu0 }
  0xbd   :  { %v392_v58 = vpop.eup %391  ;;  %v125_v59 = vadd.f32 %v375_v25, %v124_v57  ;;  %v283_v25 = vld [vmem:[%s691_s7 + $0x50] sm:$0xff] }
  0xbe   :  { %189 = vmatmul.f32.gmra.mxu1 %v392_v58  ;;  %298 = vmatpush.msra.mxu3 %v283_v25 }
  0xbf   :  { %393 = vtanh.f32 %v125_v59 }
  0xc0   :  { %299 = vmatpush.msra.mxu3 %v282_v26 }
  0xc2   :  { %300 = vmatpush.msra.mxu3 %v281_v27 }
  0xc4   :  { %301 = vmatpush.msra.mxu3 %v280_v29 }
  0xc5   :  { %v394_v60 = vpop.eup %393 }
  0xc6   :  { %192 = vmatmul.f32.gmra.mxu1 %v394_v60  ;;  %302 = vmatpush.msra.mxu3 %v279_v32 }
  0xc8   :  { %303 = vmatpush.msra.mxu3 %v278_v33 }
  0xca   :  { %304 = vmatpush.msra.mxu3 %v277_v38 }
  0xcc   :  { %305 = vmatpush.msra.mxu3 %v276_v39 }
  0xce   :  { %306 = vmatpush.msra.mxu3 %v275_v40 }
  0xd0   :  { %307 = vmatpush.msra.mxu3 %v274_v41 }
  0xd2   :  { %308 = vmatpush.msra.mxu3 %v273_v42 }
 0x10b   :  { %v172_v3 = vpop.f32.mrf.mxu0 }
 0x10c   :  { %v173_v4 = vadd.f32 %v376_v2, %v172_v3 }
 0x10e   :  { %395 = vtanh.f32 %v173_v4  ;;  %v378_v4 = vld [vmem:[%s692_s8] ss:$0 sm:$0xff] }
 0x113   :  { %v175_v5 = vpop.f32.mrf.mxu1 }
 0x114   :  { %v396_v6 = vpop.eup %395  ;;  %v176_v7 = vadd.f32 %v376_v2, %v175_v5 }
 0x115   :  { %240 = vmatmul.f32.vlgmr.msra.gmra.mxu2 %v396_v6 }
 0x116   :  { %397 = vtanh.f32 %v176_v7 }
 0x11b   :  { %v178_v8 = vpop.f32.mrf.mxu1 }
 0x11c   :  { %v398_v9 = vpop.eup %397  ;;  %v179_v10 = vadd.f32 %v376_v2, %v178_v8 }
 0x11d   :  { %243 = vmatmul.f32.gmra.mxu2 %v398_v9 }
 0x11e   :  { %399 = vtanh.f32 %v179_v10 }
 0x123   :  { %v181_v11 = vpop.f32.mrf.mxu1 }
 0x124   :  { %v400_v12 = vpop.eup %399  ;;  %v182_v13 = vadd.f32 %v376_v2, %v181_v11 }
 0x125   :  { %246 = vmatmul.f32.gmra.mxu2 %v400_v12 }
 0x126   :  { %401 = vtanh.f32 %v182_v13 }
 0x12b   :  { %v184_v14 = vpop.f32.mrf.mxu1 }
 0x12c   :  { %v402_v15 = vpop.eup %401  ;;  %v185_v16 = vadd.f32 %v376_v2, %v184_v14 }
 0x12d   :  { %249 = vmatmul.f32.gmra.mxu2 %v402_v15 }
 0x12e   :  { %403 = vtanh.f32 %v185_v16 }
 0x133   :  { %v187_v21 = vpop.f32.mrf.mxu1 }
 0x134   :  { %v404_v23 = vpop.eup %403  ;;  %v188_v24 = vadd.f32 %v376_v2, %v187_v21 }
 0x135   :  { %252 = vmatmul.f32.gmra.mxu2 %v404_v23 }
 0x136   :  { %405 = vtanh.f32 %v188_v24 }
 0x13b   :  { %v190_v28 = vpop.f32.mrf.mxu1 }
 0x13c   :  { %v406_v30 = vpop.eup %405  ;;  %v191_v31 = vadd.f32 %v376_v2, %v190_v28 }
 0x13d   :  { %255 = vmatmul.f32.gmra.mxu2 %v406_v30 }
 0x13e   :  { %407 = vtanh.f32 %v191_v31 }
 0x143   :  { %v193_v34 = vpop.f32.mrf.mxu1 }
 0x144   :  { %v408_v35 = vpop.eup %407  ;;  %v194_v36 = vadd.f32 %v376_v2, %v193_v34 }
 0x145   :  { %258 = vmatmul.f32.gmra.mxu2 %v408_v35 }
 0x146   :  { %409 = vtanh.f32 %v194_v36 }
 0x14c   :  { %v410_v37 = vpop.eup %409 }
 0x14d   :  { %261 = vmatmul.f32.gmra.mxu2 %v410_v37 }
 0x198   :  { %v241_v44 = vpop.f32.mrf.mxu2 }
 0x199   :  { %v242_v45 = vadd.f32 %v377_v43, %v241_v44 }
 0x19b   :  { %411 = vtanh.f32 %v242_v45 }
 0x1a0   :  { %v244_v46 = vpop.f32.mrf.mxu2 }
 0x1a1   :  { %v412_v47 = vpop.eup %411  ;;  %v245_v48 = vadd.f32 %v377_v43, %v244_v46 }
 0x1a2   :  { %309 = vmatmul.f32.vlgmr.msra.gmra.mxu3 %v412_v47 }
 0x1a3   :  { %413 = vtanh.f32 %v245_v48 }
 0x1a8   :  { %v247_v49 = vpop.f32.mrf.mxu2 }
 0x1a9   :  { %v414_v50 = vpop.eup %413  ;;  %v248_v51 = vadd.f32 %v377_v43, %v247_v49 }
 0x1aa   :  { %312 = vmatmul.f32.gmra.mxu3 %v414_v50 }
 0x1ab   :  { %415 = vtanh.f32 %v248_v51 }
 0x1b0   :  { %v250_v52 = vpop.f32.mrf.mxu2 }
 0x1b1   :  { %v416_v53 = vpop.eup %415  ;;  %v251_v54 = vadd.f32 %v377_v43, %v250_v52 }
 0x1b2   :  { %315 = vmatmul.f32.gmra.mxu3 %v416_v53 }
 0x1b3   :  { %417 = vtanh.f32 %v251_v54 }
 0x1b8   :  { %v253_v55 = vpop.f32.mrf.mxu2 }
 0x1b9   :  { %v418_v56 = vpop.eup %417  ;;  %v254_v57 = vadd.f32 %v377_v43, %v253_v55 }
 0x1ba   :  { %318 = vmatmul.f32.gmra.mxu3 %v418_v56 }
 0x1bb   :  { %419 = vtanh.f32 %v254_v57 }
 0x1c0   :  { %v256_v58 = vpop.f32.mrf.mxu2 }
 0x1c1   :  { %v420_v59 = vpop.eup %419  ;;  %v257_v60 = vadd.f32 %v377_v43, %v256_v58 }
 0x1c2   :  { %321 = vmatmul.f32.gmra.mxu3 %v420_v59 }
 0x1c3   :  { %421 = vtanh.f32 %v257_v60 }
 0x1c8   :  { %v259_v61 = vpop.f32.mrf.mxu2 }
 0x1c9   :  { %v422_v62 = vpop.eup %421  ;;  %v260_v63 = vadd.f32 %v377_v43, %v259_v61 }
 0x1ca   :  { %324 = vmatmul.f32.gmra.mxu3 %v422_v62 }
 0x1cb   :  { %423 = vtanh.f32 %v260_v63 }
 0x1d0   :  { %v262_v0 = vpop.f32.mrf.mxu2 }
 0x1d1   :  { %v424_v1 = vpop.eup %423  ;;  %v263_v2 = vadd.f32 %v377_v43, %v262_v0 }
 0x1d2   :  { %327 = vmatmul.f32.gmra.mxu3 %v424_v1 }
 0x1d3   :  { %425 = vtanh.f32 %v263_v2 }
 0x1d9   :  { %v426_v3 = vpop.eup %425 }
 0x1da   :  { %330 = vmatmul.f32.gmra.mxu3 %v426_v3 }
 0x225   :  { %v310_v5 = vpop.f32.mrf.mxu3 }
 0x226   :  { %v311_v6 = vadd.f32 %v378_v4, %v310_v5 }
 0x228   :  { %335 = vst.msk [vmem:[%s693_s9] sm:$0xff] %vm334_vm1, %v311_v6 }
 0x22d   :  { %v313_v7 = vpop.f32.mrf.mxu3 }
 0x22e   :  { %v314_v8 = vadd.f32 %v378_v4, %v313_v7 }
 0x230   :  { %336 = vst.msk [vmem:[%s693_s9 + $0x8] sm:$0xff] %vm334_vm1, %v314_v8 }
 0x235   :  { %v316_v9 = vpop.f32.mrf.mxu3 }
 0x236   :  { %v317_v10 = vadd.f32 %v378_v4, %v316_v9 }
 0x238   :  { %337 = vst.msk [vmem:[%s693_s9 + $0x10] sm:$0xff] %vm334_vm1, %v317_v10 }
 0x23d   :  { %v319_v11 = vpop.f32.mrf.mxu3 }
 0x23e   :  { %v320_v12 = vadd.f32 %v378_v4, %v319_v11 }
 0x240   :  { %338 = vst.msk [vmem:[%s693_s9 + $0x18] sm:$0xff] %vm334_vm1, %v320_v12 }
 0x245   :  { %v322_v13 = vpop.f32.mrf.mxu3 }
 0x246   :  { %v323_v14 = vadd.f32 %v378_v4, %v322_v13 }
 0x248   :  { %339 = vst.msk [vmem:[%s693_s9 + $0x20] sm:$0xff] %vm334_vm1, %v323_v14 }
 0x24d   :  { %v325_v15 = vpop.f32.mrf.mxu3 }
 0x24e   :  { %v326_v16 = vadd.f32 %v378_v4, %v325_v15 }
 0x250   :  { %340 = vst.msk [vmem:[%s693_s9 + $0x28] sm:$0xff] %vm334_vm1, %v326_v16 }
 0x255   :  { %v328_v17 = vpop.f32.mrf.mxu3 }
 0x256   :  { %v329_v18 = vadd.f32 %v378_v4, %v328_v17 }
 0x258   :  { %341 = vst.msk [vmem:[%s693_s9 + $0x30] sm:$0xff] %vm334_vm1, %v329_v18 }
 0x25d   :  { %v331_v19 = vpop.f32.mrf.mxu3 }
 0x25e   :  { %v332_v20 = vadd.f32 %v378_v4, %v331_v19 }
 0x260   :  { %342 = vst.msk [vmem:[%s693_s9 + $0x38] sm:$0xff] %vm334_vm1, %v332_v20 }
 0x261   :  { %347 = vsyncpa [#allocation3], 1 }

</bundles_post_ra>
